<compile_context>
chip_gen: v5e
topology: v5e:2x2
jax: 0.10.0
libtpu: 0.0.40
codegen_flags: <defaults>
</compile_context>

<pallas_src>
import functools

import jax
import jax.numpy as jnp
from jax import lax
from jax.experimental import pallas as pl
from jax.experimental.pallas import tpu as pltpu

_LANE = 128
_SUBLANE = 8


def _round_up(x, m):
    return ((x + m - 1) // m) * m


def _device_kind():
    try:
        return jax.devices()[0].device_kind.lower()
    except Exception:
        return ""


def _vmem_limit_bytes():
    """Per-generation scoped-VMEM limit (None -> leave the compiler default)."""
    kind = _device_kind()
    if "v7" in kind:
        return 40 << 20          # 64 MiB physical per TC; leave Mosaic headroom
    if "v5" in kind or "v6" in kind:
        return 96 << 20          # 128 MiB physical on v5e / v6e
    return None


def _num_tensorcores():
    return 2 if "v7" in _device_kind() else 1


def _largest_dividing_tile(total, cap):
    """Largest multiple of 128 that divides `total` and is <= cap (>= 128)."""
    t = min(total, max(cap, _LANE))
    t = (t // _LANE) * _LANE
    while t > _LANE and total % t != 0:
        t -= _LANE
    return max(t, _LANE)


# --------------------------------------------------------------------------
# Kernels
# --------------------------------------------------------------------------
def _bn_fused_kernel(x_ref, w_ref, b_ref, o_ref, *, eps, inv_n):
    # x_ref / o_ref: (N, tile_h)   w_ref / b_ref: (1, tile_h) fp32
    xf = x_ref[...].astype(jnp.float32)
    s = jnp.sum(xf, axis=0, keepdims=True)
    sq = jnp.sum(xf * xf, axis=0, keepdims=True)
    mean = s * inv_n
    var = jnp.maximum(sq * inv_n - mean * mean, 0.0)   # guard tiny cancellation
    inv_std = lax.rsqrt(var + eps)
    scale = w_ref[...] * inv_std
    shift = b_ref[...] - mean * scale
    o_ref[...] = (xf * scale + shift).astype(o_ref.dtype)


def _bn_stats_kernel(x_ref, sum_ref, sq_ref, *, tile_n, n_rows, steps_per_chunk):
    # grid = (n_par chunks, row steps); x_ref: (tile_n, H) full-width row slab.
    # sum_ref / sq_ref: (1, 1, H) per-chunk resident accumulators.
    c = pl.program_id(0)
    k = pl.program_id(1)

    @pl.when(k == 0)
    def _():
        sum_ref[...] = jnp.zeros_like(sum_ref)
        sq_ref[...] = jnp.zeros_like(sq_ref)

    # Mask rows past N (partial last tile + clamped/replayed blocks contribute 0).
    row0 = (c * steps_per_chunk + k) * tile_n
    rows = row0 + lax.broadcasted_iota(jnp.int32, (tile_n, 1), 0)
    xm = jnp.where(rows < n_rows, x_ref[...].astype(jnp.float32), 0.0)
    sum_ref[...] += jnp.sum(xm, axis=0, keepdims=True)[None]
    sq_ref[...] += jnp.sum(xm * xm, axis=0, keepdims=True)[None]


def _bn_apply_kernel(x_ref, scale_ref, shift_ref, o_ref):
    # Full-width row slab FMA; OOB rows of a partial last block are dropped by
    # Pallas' masked store, so no explicit masking is needed here.
    o_ref[...] = (x_ref[...].astype(jnp.float32) * scale_ref[...]
                  + shift_ref[...]).astype(o_ref.dtype)


# --------------------------------------------------------------------------
# Wrapper
# --------------------------------------------------------------------------
def rbatchnorm_forward(x, weight, bias, eps=1e-5, *,
                       force_two_pass=False, max_tile_h=None, max_tile_n=None):
    """x: (B, T, H).  Returns BatchNorm1d(H) (training-mode stats) applied to (B*T, H)."""
    B, T, H = x.shape
    N = B * T
    dtype = x.dtype
    itemsize = jnp.dtype(dtype).itemsize

    x2 = x.reshape(N, H)                      # metadata-only reshape, no HBM copy
    w2 = weight.reshape(1, H).astype(jnp.float32)
    b2 = bias.reshape(1, H).astype(jnp.float32)

    vmem_limit = _vmem_limit_bytes()
    budget = int((vmem_limit if vmem_limit is not None else (32 << 20)) * 0.6)
    n_cores = _num_tensorcores()

    # ----- Path A: all rows resident, one fused pass per feature tile -----
    per_elem_a = 4 * itemsize + 12            # 2x-buffered in+out (dtype) + fp32 temps
    tile_h = None
    if not force_two_pass:
        if H % _LANE == 0:
            max_t = (budget // max(N * per_elem_a, 1)) // _LANE * _LANE
            if max_t >= _LANE:
                # Keep >=2 (H>=256) / >=4 (H>=512) grid steps: DMA/compute overlap
                # and megacore sharding on v7x.
                cap = H
                if H >= 4 * _LANE:
                    cap = H // 4
                elif H >= 2 * _LANE:
                    cap = H // 2
                if max_tile_h is not None:
                    cap = min(cap, max(_LANE, (max_tile_h // _LANE) * _LANE))
                tile_h = _largest_dividing_tile(H, min(max_t, cap))
        else:
            # H not lane-aligned: single full-dim block (no padding needed).
            if N * H * per_elem_a <= budget:
                tile_h = H

    # On 2-TC chips, a 1-step grid leaves a core idle; for large N prefer the
    # row-split two-pass path instead.
    if tile_h is not None and n_cores >= 2 and (H // tile_h) < 2 and N >= 4096:
        tile_h = None

    if tile_h is not None:
        out = pl.pallas_call(
            functools.partial(_bn_fused_kernel, eps=float(eps), inv_n=1.0 / N),
            out_shape=jax.ShapeDtypeStruct((N, H), dtype),
            grid=(H // tile_h,),
            in_specs=[
                pl.BlockSpec((N, tile_h), lambda j: (0, j)),
                pl.BlockSpec((1, tile_h), lambda j: (0, j)),
                pl.BlockSpec((1, tile_h), lambda j: (0, j)),
            ],
            out_specs=pl.BlockSpec((N, tile_h), lambda j: (0, j)),
            compiler_params=pltpu.CompilerParams(
                dimension_semantics=("parallel",),
                vmem_limit_bytes=vmem_limit,
            ),
        )(x2, w2, b2)
        return out.reshape(B, T, H)

    # ----- Path B: two passes over the row axis (scales to arbitrary N) -----
    bytes_per_row = H * (4 * itemsize + 16)   # in/out double-buffers + fp32 temps
    tile_n = max(_SUBLANE, min(budget // max(bytes_per_row, 1), 1024))
    tile_n = (tile_n // _SUBLANE) * _SUBLANE
    if max_tile_n is not None:
        tile_n = min(tile_n, max(_SUBLANE, (max_tile_n // _SUBLANE) * _SUBLANE))
    if tile_n >= N:
        tile_n = N                            # single full-dim row block

    total_blocks = pl.cdiv(N, tile_n)
    n_par = min(n_cores, total_blocks)        # 1 on v5e/v6e, up to 2 on v7x
    steps = pl.cdiv(total_blocks, n_par)
    last_block = total_blocks - 1

    def x_stats_map(c, k):
        # Clamp so replayed blocks stay in bounds; the kernel masks them to 0.
        return (jnp.minimum(c * steps + k, last_block), 0)

    sums_p, sqs_p = pl.pallas_call(
        functools.partial(_bn_stats_kernel, tile_n=tile_n, n_rows=N,
                          steps_per_chunk=steps),
        out_shape=(
            jax.ShapeDtypeStruct((n_par, 1, H), jnp.float32),
            jax.ShapeDtypeStruct((n_par, 1, H), jnp.float32),
        ),
        grid=(n_par, steps),                  # reduction (rows) last
        in_specs=[pl.BlockSpec((tile_n, H), x_stats_map)],
        out_specs=(
            pl.BlockSpec((1, 1, H), lambda c, k: (c, 0, 0)),
            pl.BlockSpec((1, 1, H), lambda c, k: (c, 0, 0)),
        ),
        compiler_params=pltpu.CompilerParams(
            dimension_semantics=("parallel", "arbitrary"),
            vmem_limit_bytes=vmem_limit,
        ),
    )(x2)

    inv_n = 1.0 / N
    mean = jnp.sum(sums_p, axis=0) * inv_n                        # (1, H), tiny
    var = jnp.maximum(jnp.sum(sqs_p, axis=0) * inv_n - mean * mean, 0.0)
    inv_std = lax.rsqrt(var + eps)
    scale = w2 * inv_std
    shift = b2 - mean * scale

    out = pl.pallas_call(
        _bn_apply_kernel,
        out_shape=jax.ShapeDtypeStruct((N, H), dtype),
        grid=(total_blocks,),
        in_specs=[
            pl.BlockSpec((tile_n, H), lambda i: (i, 0)),
            pl.BlockSpec((1, H), lambda i: (0, 0)),
            pl.BlockSpec((1, H), lambda i: (0, 0)),
        ],
        out_specs=pl.BlockSpec((tile_n, H), lambda i: (i, 0)),
        compiler_params=pltpu.CompilerParams(
            dimension_semantics=("parallel",),
            vmem_limit_bytes=vmem_limit,
        ),
    )(x2, scale, shift)
    return out.reshape(B, T, H)


# --------------------------------------------------------------------------
# Reference + test
# --------------------------------------------------------------------------
def rbatchnorm_reference(x, weight, bias, eps=1e-5):
    B, T, H = x.shape
    x2 = x.reshape(B * T, H).astype(jnp.float32)
    mean = jnp.mean(x2, axis=0, keepdims=True)
    var = jnp.mean((x2 - mean) ** 2, axis=0, keepdims=True)
    y = (x2 - mean) / jnp.sqrt(var + eps) * weight.reshape(1, H).astype(jnp.float32) \
        + bias.reshape(1, H).astype(jnp.float32)
    return y.reshape(B, T, H).astype(x.dtype)


def _check(name, key, B, T, H, dtype=jnp.float32, atol=2e-4, rtol=2e-4, **kw):
    k1, k2, k3 = jax.random.split(key, 3)
    x = (jax.random.normal(k1, (B, T, H), dtype=jnp.float32) * 2.0 + 0.5).astype(dtype)
    w = jax.random.normal(k2, (H,), dtype=jnp.float32) * 0.5 + 1.0
    b = jax.random.normal(k3, (H,), dtype=jnp.float32) * 0.1
    out = jax.block_until_ready(rbatchnorm_forward(x, w, b, **kw))
    ref = rbatchnorm_reference(x, w, b)
    assert out.shape == (B, T, H), f"{name}: bad shape {out.shape}"
    assert jnp.allclose(out.astype(jnp.float32), ref.astype(jnp.float32),
                        atol=atol, rtol=rtol), f"{name}: mismatch vs reference"


if __name__ == "__main__":
    key = jax.random.PRNGKey(0)
    k0, k1, k2, k3 = jax.random.split(key, 4)

    # PaddedBatch seq_lens: passed through unchanged by RBatchNorm (not consumed here).
    seq_lens = jnp.array([8, 5], dtype=jnp.int32)

    # 1) Module-sized case (B=2, T=8, H=32): full-dim feature block, no padding (path A).
    _check("small", k0, B=2, T=8, H=32)

    # 2) Lane-aligned feature axis H=256: split into two 128-wide parallel tiles (path A).
    _check("tiled", k1, B=2, T=8, H=256)

    # 3) bf16 I/O (half the HBM bytes moved), fp32 statistics inside the kernel (path A).
    _check("bf16", k2, B=2, T=8, H=128, dtype=jnp.bfloat16, atol=5e-2, rtol=5e-2)

    # 4) Two-pass path: contiguous full-width row slabs, masked partial last row tile
    #    (N=35 not a multiple of the 16-row tile), non-lane-aligned H, no wrapper pads.
    _check("two_pass", k3, B=5, T=7, H=300, force_two_pass=True, max_tile_n=16)

    print("KERNEL_OK")
</pallas_src>

<mosaic_0001>
module attributes {stable_mosaic.version = 11 : i64} {
  func.func @_bn_fused_kernel(%arg0: i32, %arg1: memref<16x32xf32, #tpu.memory_space<vmem>>, %arg2: memref<1x32xf32, #tpu.memory_space<vmem>>, %arg3: memref<1x32xf32, #tpu.memory_space<vmem>>, %arg4: memref<16x32xf32, #tpu.memory_space<vmem>>) attributes {dimension_semantics = [#tpu.dimension_semantics<parallel>], iteration_bounds = array<i64: 1>, scalar_prefetch = 0 : i64, scratch_operands = 0 : i64, tpu.core_type = #tpu.core_type<tc>, window_params = [{transform_indices = @transform_0, window_bounds = array<i64: 16, 32>}, {transform_indices = @transform_1, window_bounds = array<i64: 1, 32>}, {transform_indices = @transform_2, window_bounds = array<i64: 1, 32>}, {transform_indices = @transform_3, window_bounds = array<i64: 16, 32>}]} {
    %c0 = arith.constant 0 : index
    %c0_0 = arith.constant 0 : index
    %0 = vector.load %arg1[%c0, %c0_0] : memref<16x32xf32, #tpu.memory_space<vmem>>, vector<16x32xf32>
    %cst = arith.constant dense<0.000000e+00> : vector<32xf32>
    %1 = vector.multi_reduction <add>, %0, %cst [0] : vector<16x32xf32> to vector<32xf32>
    %2 = vector.shape_cast %1 : vector<32xf32> to vector<1x32xf32>
    %3 = arith.mulf %0, %0 : vector<16x32xf32>
    %cst_1 = arith.constant dense<0.000000e+00> : vector<32xf32>
    %4 = vector.multi_reduction <add>, %3, %cst_1 [0] : vector<16x32xf32> to vector<32xf32>
    %5 = vector.shape_cast %4 : vector<32xf32> to vector<1x32xf32>
    %cst_2 = arith.constant 6.250000e-02 : f32
    %6 = vector.broadcast %cst_2 : f32 to vector<1x32xf32>
    %7 = arith.mulf %2, %6 : vector<1x32xf32>
    %cst_3 = arith.constant 6.250000e-02 : f32
    %8 = vector.broadcast %cst_3 : f32 to vector<1x32xf32>
    %9 = arith.mulf %5, %8 : vector<1x32xf32>
    %10 = arith.mulf %7, %7 : vector<1x32xf32>
    %11 = arith.subf %9, %10 : vector<1x32xf32>
    %cst_4 = arith.constant 0.000000e+00 : f32
    %12 = vector.broadcast %cst_4 : f32 to vector<1x32xf32>
    %13 = arith.maximumf %11, %12 : vector<1x32xf32>
    %cst_5 = arith.constant 9.99999974E-6 : f32
    %14 = vector.broadcast %cst_5 : f32 to vector<1x32xf32>
    %15 = arith.addf %13, %14 : vector<1x32xf32>
    %16 = math.rsqrt %15 : vector<1x32xf32>
    %c0_6 = arith.constant 0 : index
    %c0_7 = arith.constant 0 : index
    %17 = vector.load %arg2[%c0_6, %c0_7] : memref<1x32xf32, #tpu.memory_space<vmem>>, vector<1x32xf32>
    %18 = arith.mulf %17, %16 : vector<1x32xf32>
    %c0_8 = arith.constant 0 : index
    %c0_9 = arith.constant 0 : index
    %19 = vector.load %arg3[%c0_8, %c0_9] : memref<1x32xf32, #tpu.memory_space<vmem>>, vector<1x32xf32>
    %20 = arith.mulf %7, %18 : vector<1x32xf32>
    %21 = arith.subf %19, %20 : vector<1x32xf32>
    %22 = vector.broadcast %18 : vector<1x32xf32> to vector<16x32xf32>
    %23 = arith.mulf %0, %22 : vector<16x32xf32>
    %24 = vector.broadcast %21 : vector<1x32xf32> to vector<16x32xf32>
    %25 = arith.addf %23, %24 : vector<16x32xf32>
    %c0_10 = arith.constant 0 : index
    %c0_11 = arith.constant 0 : index
    %26 = vector.load %arg4[%c0_10, %c0_11] : memref<16x32xf32, #tpu.memory_space<vmem>>, vector<16x32xf32>
    tpu.vector_store %arg4[%c0_10, %c0_11], %25 {strides = array<i32>} : memref<16x32xf32, #tpu.memory_space<vmem>>, vector<16x32xf32>,
    return
  }
  func.func @transform_0(%arg0: i32) -> (i32, i32) {
    %c0_i32 = arith.constant 0 : i32
    %c0_i32_0 = arith.constant 0 : i32
    return %c0_i32, %arg0 : i32, i32
  }
  func.func @transform_1(%arg0: i32) -> (i32, i32) {
    %c0_i32 = arith.constant 0 : i32
    %c0_i32_0 = arith.constant 0 : i32
    return %c0_i32, %arg0 : i32, i32
  }
  func.func @transform_2(%arg0: i32) -> (i32, i32) {
    %c0_i32 = arith.constant 0 : i32
    %c0_i32_0 = arith.constant 0 : i32
    return %c0_i32, %arg0 : i32, i32
  }
  func.func @transform_3(%arg0: i32) -> (i32, i32) {
    %c0_i32 = arith.constant 0 : i32
    %c0_i32_0 = arith.constant 0 : i32
    return %c0_i32, %arg0 : i32, i32
  }
}

</mosaic_0001>

<bundles_post_ra>
// kernel: tpu_custom_call.1
= control target key start
LH: loop header
LB: loop body
LE: loop exit
PB: predicated region body
PF: predicated region fallthrough
CT: control target
= control target key end

     0   :  { %8 = vsyncpa [#allocation3], 0  ;;  %s255_s0 = inlined_call_operand.hbm [shape: f32[16,32], index: 0, kind: input, shape index: {}]   ;;  %s256_s1 = inlined_call_operand.hbm [shape: f32[1,32], index: 1, kind: input, shape index: {}]   ;;  %s257_s2 = inlined_call_operand.vmem [shape: f32[1,32], index: 2, kind: input, shape index: {}]   ;;  %s258_s3 = inlined_call_operand.hbm [shape: f32[16,32], index: 3, kind: output, shape index: {}]  }
   0x1   :  { %9 = vsyncpa [#allocation6], 0 }
   0x2   :  { %10 = vsyncpa [#allocation4], 0  ;;  %s15_s14 = sshll.u32 %s255_s0, 4  ;;  %s206_s15 = smov [#allocation2]   ;;  %s16_s14 = int_to_ptr.hbm [resolvable:$true] %s15_s14 }
   0x3   :  { %s17_s16 = sshll.u32 %s206_s15, 4  ;;  %s29_s19 = sshll.u32 %s256_s1, 4  ;;  %s18_s16 = int_to_ptr.vmem [resolvable:$true] %s17_s16  ;;  %s30_s19 = int_to_ptr.hbm [resolvable:$true] %s29_s19 }
   0x4   :  { %s207_s20 = smov 128   ;;  %s208_s21 = smov 8  }
   0x5   :  { %23 = dma.hbm_to_vmem [thread:$0]  %s16_s14, 256, %s18_s16, [#allocation3], %s207_s20, %s207_s20, %s208_s21  }
   0x6   :  { %s209_s22 = smov [#allocation5]  }
   0x7   :  { %s31_s23 = sshll.u32 %s209_s22, 4  ;;  %s32_s23 = int_to_ptr.vmem [resolvable:$true] %s31_s23 }
   0x8   :  { %34 = dma.hbm_to_vmem [thread:$0]  %s30_s19, 16, %s32_s23, [#allocation6]  }
   0x9   :  { %200 = dma.done.wait [#allocation3], 256  }
   0xa   :  { %201 = vsyncadd [#allocation3], 4294967040 }
   0xb   :  { %202 = dma.done.wait [#allocation6], 16  }
   0xc   :  { %203 = vsyncadd [#allocation6], 4294967280  ;;  %vm47_vm0 = vcmask 261120   ;;  %v45_v0 = vld [vmem:[#allocation2] sm:$0xff]  ;;  %v46_v1 = vld [vmem:[#allocation2 + $0x8] sm:$0xff]  ;;  %s210_s24 = smov [#allocation7]  }
   0xd   :  { %v48_v2 = vsel %vm47_vm0, %v45_v0, 0.0  ;;  %v49_v3 = vsel %vm47_vm0, %v46_v1, 0.0  ;;  %v57_v4 = vmul.f32 %v45_v0, %v45_v0  ;;  %v58_v5 = vmul.f32 %v46_v1, %v46_v1  ;;  %v84_v34 = vld [vmem:[#allocation5] sm:$0x1]  ;;  %v86_v37 = vld [vmem:[%s257_s2] sm:$0x1] }
   0xe   :  { %v50_v6 = vadd.f32 %v49_v3, %v48_v2  ;;  %s105_s25 = sshll.u32 %s210_s24, 4  ;;  %s107_s28 = sshll.u32 %s258_s3, 4  ;;  %s106_s25 = int_to_ptr.vmem [resolvable:$true] %s105_s25  ;;  %s108_s28 = int_to_ptr.hbm [resolvable:$true] %s107_s28 }
   0xf   :  { %v59_v7 = vsel %vm47_vm0, %v57_v4, 0.0  ;;  %v60_v8 = vsel %vm47_vm0, %v58_v5, 0.0 }
  0x10   :  { %v51_v9 = vrot.slane %v50_v6, 4  ;;  %v61_v10 = vadd.f32 %v60_v8, %v59_v7 }
  0x12   :  { %v52_v11 = vadd.f32 %v51_v9, %v50_v6  ;;  %v62_v12 = vrot.slane %v61_v10, 4 }
  0x14   :  { %v53_v13 = vrot.slane %v52_v11, 2  ;;  %v63_v14 = vadd.f32 %v62_v12, %v61_v10 }
  0x16   :  { %v54_v15 = vadd.f32 %v53_v13, %v52_v11  ;;  %v64_v16 = vrot.slane %v63_v14, 2 }
  0x18   :  { %v55_v17 = vrot.slane %v54_v15, 1  ;;  %v65_v18 = vadd.f32 %v64_v16, %v63_v14 }
  0x1a   :  { %v56_v19 = vadd.f32 %v55_v17, %v54_v15  ;;  %v66_v20 = vrot.slane %v65_v18, 1 }
  0x1c   :  { %v67_v21 = vadd.f32 %v66_v20, %v65_v18  ;;  %v68_v22 = vmul.f32 0.0625, %v56_v19 }
  0x1e   :  { %v69_v23 = vmul.f32 0.0625, %v67_v21  ;;  %v70_v24 = vmul.f32 %v68_v22, %v68_v22 }
  0x20   :  { %v71_v25 = vsub.f32 %v69_v23, %v70_v24 }
  0x22   :  { %v72_v26 = vmax.f32 %v71_v25, 0.0 }
  0x24   :  { %v73_v27 = vadd.f32 1e-05, %v72_v26 }
  0x26   :  { %126 = vrsqrt.f32 %v73_v27  ;;  %vm80_vm1 = vweird.f32 %v73_v27 }
  0x2c   :  { %v127_v28 = vpop.eup %126 }
  0x2d   :  { %v75_v29 = vmul.f32 %v127_v28, %v73_v27  ;;  %vm81_vm2 = vweird.f32 %v127_v28 }
  0x2e   :  { %vm82_vm3 = vmor %vm80_vm1, %vm81_vm2 }
  0x2f   :  { %v76_v30 = vmul.f32 %v127_v28, %v75_v29 }
  0x31   :  { %v77_v31 = vmul.f32 0.5, %v76_v30 }
  0x33   :  { %v78_v32 = vsub.f32 1.5, %v77_v31 }
  0x35   :  { %v79_v33 = vmul.f32 %v127_v28, %v78_v32 }
  0x37   :  { %v83_v35 = vsel %vm82_vm3, %v127_v28, %v79_v33 }
  0x38   :  { %v85_v36 = vmul.f32 %v84_v34, %v83_v35 }
  0x3a   :  { %v87_v38 = vmul.f32 %v85_v36, %v68_v22  ;;  %v90_v39 = vperm.slane %v85_v36, 0 }
  0x3c   :  { %v88_v40 = vsub.f32 %v86_v37, %v87_v38  ;;  %v92_v41 = vmul.f32 %v90_v39, %v45_v0  ;;  %v93_v42 = vmul.f32 %v90_v39, %v46_v1 }
  0x3e   :  { %v95_v43 = vperm.slane %v88_v40, 0 }
  0x40   :  { %v97_v44 = vadd.f32 %v95_v43, %v92_v41  ;;  %v98_v45 = vadd.f32 %v95_v43, %v93_v42 }
  0x42   :  { %99 = vst.msk [vmem:[#allocation7] sm:$0xff] %vm47_vm0, %v97_v44 }
  0x43   :  { %100 = vst.msk [vmem:[#allocation7 + $0x8] sm:$0xff] %vm47_vm0, %v98_v45 }
  0x44   :  { %113 = dma.vmem_to_hbm [thread:$0]  %s106_s25, 256, %s108_s28, [#allocation4], %s207_s20, %s207_s20, %s208_s21  }
  0x45   :  { %204 = dma.done.wait [#allocation4], 256  }
  0x46   :  { %205 = vsyncadd [#allocation4], 4294967040 }
  0x47   :  { %118 = vsyncpa [#allocation3], 1 }
  0x48   :  { %119 = vsyncpa [#allocation6], 1 }
  0x49   :  { %120 = vsyncpa [#allocation4], 1 }

</bundles_post_ra>
